<compile_context>
chip_gen: v5e
topology: v5e:2x2
jax: 0.10.0
libtpu: 0.0.40
codegen_flags: <defaults>
</compile_context>

<pallas_src>
import functools

import jax
import jax.numpy as jnp
from jax.experimental import pallas as pl
from jax.experimental.pallas import tpu as pltpu

_LANE = 128
_F32_SUBLANE = 8
_BF16_SUBLANE = 16


def _round_up(x, m):
    return ((x + m - 1) // m) * m


def _device_kind():
    try:
        return jax.devices()[0].device_kind.lower()
    except Exception:
        return ""


def _is_v5(kind):
    return "v5" in kind


def _is_v7(kind):
    return "v7" in kind


def _vmem_capacity_bytes(kind):
    try:
        cap = int(getattr(pltpu.get_tpu_info(), "vmem_capacity_bytes", 0))
        if cap > 0:
            return cap
    except Exception:
        pass
    # Conservative fallbacks: v7x has 64 MiB/TC, older generations 128 MiB.
    return (64 << 20) if _is_v7(kind) else (128 << 20)


def _pad_feature_dim(d, kind):
    """Lane-dense padding: 128 always; 256 on v6e/v7x if the extra work is <~15%."""
    p128 = _round_up(d, _LANE)
    if (not _is_v5(kind)) and d > _LANE:
        p256 = _round_up(d, 256)
        if p256 <= int(1.15 * p128):
            return p256
    return p128


def _choose_tile_b(B, compute_dtype, kind, total_weight_bytes):
    granule = _BF16_SUBLANE if compute_dtype == jnp.bfloat16 else _F32_SUBLANE
    # Tiny batches: a single grid step, rounded to the dtype's sublane-packing granule
    # (16 rows for bf16 so vregs are fully packed, 8 for f32).
    if B <= 128:
        return _round_up(B, granule)
    # v5-class MXU is 128-wide and the scoped-VMEM default is small -> 128-row tiles.
    # v6e/v7x MXUs are 256-wide -> 256-row tiles.
    base = 128 if _is_v5(kind) else 256
    # Streaming-bound regime (tiny resident weights, big batch): larger tiles amortize
    # the ~0.35us/grid-step overhead (63% -> ~85% of HBM roofline at 512-row tiles).
    if total_weight_bytes <= (4 << 20) and B >= 1024:
        base = 512
    tile = min(base, _round_up(B, granule))
    # v7x megacore: make sure there are >= 2 grid steps so ("parallel",) can shard the
    # batch across both TensorCores.
    if _is_v7(kind) and _round_up(B, tile) // tile < 2 and B > granule:
        half = _round_up((B + 1) // 2, granule)
        tile = max(granule, min(tile, half))
    return tile


def _mlp_kernel(n_layers, compute_dtype, *refs):
    # refs = (x_ref, w0, b0, w1, b1, ..., out_ref)
    x_ref = refs[0]
    out_ref = refs[-1]
    h = x_ref[...]  # lane-dense tile, already in compute_dtype
    for i in range(n_layers):
        w = refs[1 + 2 * i][...]
        b = refs[2 + 2 * i][...]
        acc = jnp.dot(h, w, preferred_element_type=jnp.float32)  # MXU, f32 accumulate
        acc = acc + b.astype(jnp.float32)
        acc = jnp.maximum(acc, 0.0)  # activation after EVERY layer (matches torch)
        if i < n_layers - 1:
            h = acc.astype(compute_dtype)  # feed the MXU its native bf16 (if selected)
        else:
            h = acc
    out_ref[...] = h.astype(out_ref.dtype)


def prepare_decoder_vae_params(weights, biases, compute_dtype=jnp.bfloat16):
    """One-time padding/cast of the decoder weights (hoisted out of the per-call path).

    weights: list of (in_i, out_i) f32 arrays (already transposed vs torch's (out, in))
    biases:  list of (1, out_i) f32 arrays
    """
    kind = _device_kind()
    dims = [weights[0].shape[0]] + [w.shape[1] for w in weights]
    dims_pad = [_pad_feature_dim(d, kind) for d in dims]

    weights_p, biases_p = [], []
    for li, (w, b) in enumerate(zip(weights, biases)):
        d_in, d_out = dims_pad[li], dims_pad[li + 1]
        w_p = (
            jnp.zeros((d_in, d_out), compute_dtype)
            .at[: w.shape[0], : w.shape[1]]
            .set(w.astype(compute_dtype))
        )
        b_p = (
            jnp.zeros((1, d_out), jnp.float32)
            .at[:, : b.shape[1]]
            .set(b.astype(jnp.float32))
        )
        weights_p.append(w_p)
        biases_p.append(b_p)

    return {
        "weights": weights_p,
        "biases": biases_p,
        "dims": tuple(dims),
        "dims_pad": tuple(dims_pad),
        "compute_dtype": compute_dtype,
        "device_kind": kind,
    }


def decoder_vae_forward(lat, params, out_dtype=jnp.float32):
    """Fused DecoderVAE forward. lat: (B, latent) f32. Returns (B, out_size) out_dtype."""
    weights_p, biases_p = params["weights"], params["biases"]
    dims, dims_pad = params["dims"], params["dims_pad"]
    cdt, kind = params["compute_dtype"], params["device_kind"]
    n_layers = len(weights_p)

    B, latent = lat.shape
    assert latent == dims[0], (latent, dims[0])

    total_w_bytes = sum(int(w.size) * w.dtype.itemsize for w in weights_p)
    total_b_bytes = sum(int(b.size) * b.dtype.itemsize for b in biases_p)
    # TODO(synk): add a weight-streaming path (extra "arbitrary" grid axis over the
    # contraction/output-feature dims with a VMEM f32 accumulator and pl.when
    # init/finalize) when total_w_bytes exceeds ~40 MiB; the fully-resident design
    # below assumes all padded weights fit in VMEM (v7x: 64 MiB).

    tile_b = _choose_tile_b(B, cdt, kind, total_w_bytes)
    b_pad = _round_up(B, tile_b)

    # Only the activations are padded per call; weights/biases were prepared once.
    lat_p = (
        jnp.zeros((b_pad, dims_pad[0]), cdt).at[:B, :latent].set(lat.astype(cdt))
    )

    args = [lat_p]
    for w_p, b_p in zip(weights_p, biases_p):
        args.append(w_p)
        args.append(b_p)

    out_shape = jax.ShapeDtypeStruct((b_pad, dims_pad[-1]), out_dtype)
    out_spec = pl.BlockSpec((tile_b, dims_pad[-1]), lambda i: (i, 0))

    flops = 2 * b_pad * sum(dims_pad[i] * dims_pad[i + 1] for i in range(n_layers))
    bytes_in = sum(int(a.size) * a.dtype.itemsize for a in args)
    bytes_out = b_pad * dims_pad[-1] * jnp.dtype(out_dtype).itemsize
    cost = pl.CostEstimate(
        flops=flops, transcendentals=0, bytes_accessed=bytes_in + bytes_out
    )

    kernel = functools.partial(_mlp_kernel, n_layers, cdt)
    c_item = jnp.dtype(cdt).itemsize

    def build_and_call(single_buffer_const):
        in_specs = [pl.BlockSpec((tile_b, dims_pad[0]), lambda i: (i, 0))]
        for li in range(n_layers):
            d_in, d_out = dims_pad[li], dims_pad[li + 1]
            kw = {"pipeline_mode": pl.Buffered(1)} if single_buffer_const else {}
            # Weights / biases: full array as a single block, same block every grid
            # step -> DMA'd once, resident in VMEM across the whole batch loop.
            in_specs.append(pl.BlockSpec((d_in, d_out), lambda i: (0, 0), **kw))
            in_specs.append(pl.BlockSpec((1, d_out), lambda i: (0, 0), **kw))

        # Explicit VMEM budget (the default scoped limit of 16/32 MiB is the first thing
        # that breaks the resident-weight design at realistic hidden sizes).
        w_mult = 1 if single_buffer_const else 2
        need = (
            w_mult * (total_w_bytes + total_b_bytes)
            + 2 * tile_b * dims_pad[0] * c_item                       # in tile, 2 bufs
            + 2 * tile_b * dims_pad[-1] * jnp.dtype(out_dtype).itemsize  # out tile, 2 bufs
            + 2 * tile_b * max(dims_pad) * 4                          # f32 activation scratch
        )
        vmem_limit = int(need * 1.25)                 # ~25% headroom
        vmem_limit = max(vmem_limit, 32 << 20)        # never below the default scoped limit
        vmem_limit = min(vmem_limit, _vmem_capacity_bytes(kind) - (8 << 20))

        return pl.pallas_call(
            kernel,
            out_shape=out_shape,
            grid=(b_pad // tile_b,),
            in_specs=in_specs,
            out_specs=out_spec,
            compiler_params=pltpu.CompilerParams(
                # Batch steps are independent -> shard across v7x's 2 TensorCores.
                dimension_semantics=("parallel",),
                vmem_limit_bytes=vmem_limit,
            ),
            cost_estimate=cost,
        )(*args)

    try:
        out = build_and_call(True)
    except Exception:
        # Some Pallas versions reject Buffered(1); fall back to default double-buffering
        # (budget recomputed with 2x weights).
        out = build_and_call(False)

    # Slice away batch/feature padding in the wrapper (kernel stays lane-dense).
    return out[:B, : dims[-1]]


def init_decoder_vae_params(key, latent_size, hidden_size, out_size, layers=1):
    """Deterministic init mimicking nn.Linear's U(-1/sqrt(fan_in), 1/sqrt(fan_in))."""
    # Layer structure from the torch __init__:
    #   [Linear(latent, hidden)] + [Linear(hidden, hidden)]*(layers-2) + [Linear(hidden, out)]
    dims = [latent_size, hidden_size] + [hidden_size] * max(layers - 2, 0) + [out_size]
    weights, biases = [], []
    for i in range(len(dims) - 1):
        fan_in, fan_out = dims[i], dims[i + 1]
        key, kw, kb = jax.random.split(key, 3)
        bound = 1.0 / jnp.sqrt(fan_in)
        w = jax.random.uniform(kw, (fan_in, fan_out), jnp.float32, -bound, bound)
        b = jax.random.uniform(kb, (1, fan_out), jnp.float32, -bound, bound)
        weights.append(w)
        biases.append(b)
    return weights, biases


def decoder_vae_ref(lat, weights, biases):
    """Pure-JAX (f32) reference of the torch forward."""
    out = lat
    for w, b in zip(weights, biases):
        out = jnp.maximum(out @ w + b, 0.0)
    return out


if __name__ == "__main__":
    key = jax.random.PRNGKey(0)
    batch, latent_size, hidden_size, out_size, layers = 8, 32, 64, 16, 3

    key, k_lat = jax.random.split(key)
    lat = jax.random.normal(k_lat, (batch, latent_size), jnp.float32)

    weights, biases = init_decoder_vae_params(
        key, latent_size, hidden_size, out_size, layers=layers
    )

    ref = decoder_vae_ref(lat, weights, biases)

    # f32 compute path: exact-precision check against the reference.
    params_f32 = prepare_decoder_vae_params(weights, biases, compute_dtype=jnp.float32)
    out_f32 = jax.block_until_ready(decoder_vae_forward(lat, params_f32))
    assert out_f32.shape == (batch, out_size), out_f32.shape
    assert jnp.allclose(out_f32, ref, atol=1e-5, rtol=1e-5), "f32 mismatch vs reference"

    # bf16 compute path (MXU-native operands, f32 accumulation): looser tolerance.
    params_bf16 = prepare_decoder_vae_params(weights, biases, compute_dtype=jnp.bfloat16)
    out_bf16 = jax.block_until_ready(decoder_vae_forward(lat, params_bf16))
    assert out_bf16.shape == (batch, out_size), out_bf16.shape
    assert jnp.allclose(out_bf16, ref, atol=5e-2, rtol=5e-2), "bf16 mismatch vs reference"

    print("KERNEL_OK")
</pallas_src>

<mosaic_0001>
module attributes {stable_mosaic.version = 11 : i64} {
  func.func @_mlp_kernel(%arg0: i32, %arg1: memref<8x128xf32, #tpu.memory_space<vmem>>, %arg2: memref<128x128xf32, #tpu.memory_space<vmem>>, %arg3: memref<1x128xf32, #tpu.memory_space<vmem>>, %arg4: memref<128x128xf32, #tpu.memory_space<vmem>>, %arg5: memref<1x128xf32, #tpu.memory_space<vmem>>, %arg6: memref<128x128xf32, #tpu.memory_space<vmem>>, %arg7: memref<1x128xf32, #tpu.memory_space<vmem>>, %arg8: memref<8x128xf32, #tpu.memory_space<vmem>>) attributes {dimension_semantics = [#tpu.dimension_semantics<parallel>], iteration_bounds = array<i64: 1>, scalar_prefetch = 0 : i64, scratch_operands = 0 : i64, tpu.core_type = #tpu.core_type<tc>, window_params = [{transform_indices = @transform_0, window_bounds = array<i64: 8, 128>}, {pipeline_mode = #tpu.pipeline_mode<synchronous>, transform_indices = @transform_1, window_bounds = array<i64: 128, 128>}, {pipeline_mode = #tpu.pipeline_mode<synchronous>, transform_indices = @transform_2, window_bounds = array<i64: 1, 128>}, {pipeline_mode = #tpu.pipeline_mode<synchronous>, transform_indices = @transform_3, window_bounds = array<i64: 128, 128>}, {pipeline_mode = #tpu.pipeline_mode<synchronous>, transform_indices = @transform_4, window_bounds = array<i64: 1, 128>}, {pipeline_mode = #tpu.pipeline_mode<synchronous>, transform_indices = @transform_5, window_bounds = array<i64: 128, 128>}, {pipeline_mode = #tpu.pipeline_mode<synchronous>, transform_indices = @transform_6, window_bounds = array<i64: 1, 128>}, {transform_indices = @transform_7, window_bounds = array<i64: 8, 128>}]} {
    %c0 = arith.constant 0 : index
    %c0_0 = arith.constant 0 : index
    %0 = vector.load %arg1[%c0, %c0_0] : memref<8x128xf32, #tpu.memory_space<vmem>>, vector<8x128xf32>
    %c0_1 = arith.constant 0 : index
    %c0_2 = arith.constant 0 : index
    %1 = vector.load %arg2[%c0_1, %c0_2] : memref<128x128xf32, #tpu.memory_space<vmem>>, vector<128x128xf32>
    %c0_3 = arith.constant 0 : index
    %c0_4 = arith.constant 0 : index
    %2 = vector.load %arg3[%c0_3, %c0_4] : memref<1x128xf32, #tpu.memory_space<vmem>>, vector<1x128xf32>
    %cst = arith.constant dense<0.000000e+00> : vector<8x128xf32>
    %3 = tpu.matmul %0, %1, %cst {dimension_numbers = #tpu.dot_dimension_numbers<[1], [0], [0], [1], [0, 0, 1, 1], [], []>} : vector<8x128xf32>, vector<128x128xf32>, vector<8x128xf32> -> vector<8x128xf32>
    %4 = vector.broadcast %2 : vector<1x128xf32> to vector<8x128xf32>
    %5 = arith.addf %3, %4 : vector<8x128xf32>
    %cst_5 = arith.constant 0.000000e+00 : f32
    %6 = vector.broadcast %cst_5 : f32 to vector<8x128xf32>
    %7 = arith.maximumf %5, %6 : vector<8x128xf32>
    %c0_6 = arith.constant 0 : index
    %c0_7 = arith.constant 0 : index
    %8 = vector.load %arg4[%c0_6, %c0_7] : memref<128x128xf32, #tpu.memory_space<vmem>>, vector<128x128xf32>
    %c0_8 = arith.constant 0 : index
    %c0_9 = arith.constant 0 : index
    %9 = vector.load %arg5[%c0_8, %c0_9] : memref<1x128xf32, #tpu.memory_space<vmem>>, vector<1x128xf32>
    %cst_10 = arith.constant dense<0.000000e+00> : vector<8x128xf32>
    %10 = tpu.matmul %7, %8, %cst_10 {dimension_numbers = #tpu.dot_dimension_numbers<[1], [0], [0], [1], [0, 0, 1, 1], [], []>} : vector<8x128xf32>, vector<128x128xf32>, vector<8x128xf32> -> vector<8x128xf32>
    %11 = vector.broadcast %9 : vector<1x128xf32> to vector<8x128xf32>
    %12 = arith.addf %10, %11 : vector<8x128xf32>
    %cst_11 = arith.constant 0.000000e+00 : f32
    %13 = vector.broadcast %cst_11 : f32 to vector<8x128xf32>
    %14 = arith.maximumf %12, %13 : vector<8x128xf32>
    %c0_12 = arith.constant 0 : index
    %c0_13 = arith.constant 0 : index
    %15 = vector.load %arg6[%c0_12, %c0_13] : memref<128x128xf32, #tpu.memory_space<vmem>>, vector<128x128xf32>
    %c0_14 = arith.constant 0 : index
    %c0_15 = arith.constant 0 : index
    %16 = vector.load %arg7[%c0_14, %c0_15] : memref<1x128xf32, #tpu.memory_space<vmem>>, vector<1x128xf32>
    %cst_16 = arith.constant dense<0.000000e+00> : vector<8x128xf32>
    %17 = tpu.matmul %14, %15, %cst_16 {dimension_numbers = #tpu.dot_dimension_numbers<[1], [0], [0], [1], [0, 0, 1, 1], [], []>} : vector<8x128xf32>, vector<128x128xf32>, vector<8x128xf32> -> vector<8x128xf32>
    %18 = vector.broadcast %16 : vector<1x128xf32> to vector<8x128xf32>
    %19 = arith.addf %17, %18 : vector<8x128xf32>
    %cst_17 = arith.constant 0.000000e+00 : f32
    %20 = vector.broadcast %cst_17 : f32 to vector<8x128xf32>
    %21 = arith.maximumf %19, %20 : vector<8x128xf32>
    %c0_18 = arith.constant 0 : index
    %c0_19 = arith.constant 0 : index
    %22 = vector.load %arg8[%c0_18, %c0_19] : memref<8x128xf32, #tpu.memory_space<vmem>>, vector<8x128xf32>
    tpu.vector_store %arg8[%c0_18, %c0_19], %21 {strides = array<i32>} : memref<8x128xf32, #tpu.memory_space<vmem>>, vector<8x128xf32>,
    return
  }
  func.func @transform_0(%arg0: i32) -> (i32, i32) {
    %c0_i32 = arith.constant 0 : i32
    %c0_i32_0 = arith.constant 0 : i32
    return %arg0, %c0_i32 : i32, i32
  }
  func.func @transform_1(%arg0: i32) -> (i32, i32) {
    %c0_i32 = arith.constant 0 : i32
    %c0_i32_0 = arith.constant 0 : i32
    %c0_i32_1 = arith.constant 0 : i32
    return %c0_i32, %c0_i32_0 : i32, i32
  }
  func.func @transform_2(%arg0: i32) -> (i32, i32) {
    %c0_i32 = arith.constant 0 : i32
    %c0_i32_0 = arith.constant 0 : i32
    %c0_i32_1 = arith.constant 0 : i32
    return %c0_i32, %c0_i32_0 : i32, i32
  }
  func.func @transform_3(%arg0: i32) -> (i32, i32) {
    %c0_i32 = arith.constant 0 : i32
    %c0_i32_0 = arith.constant 0 : i32
    %c0_i32_1 = arith.constant 0 : i32
    return %c0_i32, %c0_i32_0 : i32, i32
  }
  func.func @transform_4(%arg0: i32) -> (i32, i32) {
    %c0_i32 = arith.constant 0 : i32
    %c0_i32_0 = arith.constant 0 : i32
    %c0_i32_1 = arith.constant 0 : i32
    return %c0_i32, %c0_i32_0 : i32, i32
  }
  func.func @transform_5(%arg0: i32) -> (i32, i32) {
    %c0_i32 = arith.constant 0 : i32
    %c0_i32_0 = arith.constant 0 : i32
    %c0_i32_1 = arith.constant 0 : i32
    return %c0_i32, %c0_i32_0 : i32, i32
  }
  func.func @transform_6(%arg0: i32) -> (i32, i32) {
    %c0_i32 = arith.constant 0 : i32
    %c0_i32_0 = arith.constant 0 : i32
    %c0_i32_1 = arith.constant 0 : i32
    return %c0_i32, %c0_i32_0 : i32, i32
  }
  func.func @transform_7(%arg0: i32) -> (i32, i32) {
    %c0_i32 = arith.constant 0 : i32
    %c0_i32_0 = arith.constant 0 : i32
    return %arg0, %c0_i32 : i32, i32
  }
}

module attributes {stable_mosaic.version = 11 : i64} {
  func.func @_mlp_kernel(%arg0: i32, %arg1: memref<8x128xf32, #tpu.memory_space<vmem>>, %arg2: memref<128x128xf32, #tpu.memory_space<vmem>>, %arg3: memref<1x128xf32, #tpu.memory_space<vmem>>, %arg4: memref<128x128xf32, #tpu.memory_space<vmem>>, %arg5: memref<1x128xf32, #tpu.memory_space<vmem>>, %arg6: memref<128x128xf32, #tpu.memory_space<vmem>>, %arg7: memref<1x128xf32, #tpu.memory_space<vmem>>, %arg8: memref<8x128xf32, #tpu.memory_space<vmem>>) attributes {dimension_semantics = [#tpu.dimension_semantics<parallel>], iteration_bounds = array<i64: 1>, scalar_prefetch = 0 : i64, scratch_operands = 0 : i64, tpu.core_type = #tpu.core_type<tc>, window_params = [{transform_indices = @transform_0, window_bounds = array<i64: 8, 128>}, {pipeline_mode = #tpu.pipeline_mode<synchronous>, transform_indices = @transform_1, window_bounds = array<i64: 128, 128>}, {pipeline_mode = #tpu.pipeline_mode<synchronous>, transform_indices = @transform_2, window_bounds = array<i64: 1, 128>}, {pipeline_mode = #tpu.pipeline_mode<synchronous>, transform_indices = @transform_3, window_bounds = array<i64: 128, 128>}, {pipeline_mode = #tpu.pipeline_mode<synchronous>, transform_indices = @transform_4, window_bounds = array<i64: 1, 128>}, {pipeline_mode = #tpu.pipeline_mode<synchronous>, transform_indices = @transform_5, window_bounds = array<i64: 128, 128>}, {pipeline_mode = #tpu.pipeline_mode<synchronous>, transform_indices = @transform_6, window_bounds = array<i64: 1, 128>}, {transform_indices = @transform_7, window_bounds = array<i64: 8, 128>}]} {
    %c0 = arith.constant 0 : index
    %c0_0 = arith.constant 0 : index
    %0 = vector.load %arg1[%c0, %c0_0] : memref<8x128xf32, #tpu.memory_space<vmem>>, vector<8x128xf32>
    %c0_1 = arith.constant 0 : index
    %c0_2 = arith.constant 0 : index
    %1 = vector.load %arg2[%c0_1, %c0_2] : memref<128x128xf32, #tpu.memory_space<vmem>>, vector<128x128xf32>
    %c0_3 = arith.constant 0 : index
    %c0_4 = arith.constant 0 : index
    %2 = vector.load %arg3[%c0_3, %c0_4] : memref<1x128xf32, #tpu.memory_space<vmem>>, vector<1x128xf32>
    %cst = arith.constant dense<0.000000e+00> : vector<8x128xf32>
    %3 = tpu.matmul %0, %1, %cst {dimension_numbers = #tpu.dot_dimension_numbers<[1], [0], [0], [1], [0, 0, 1, 1], [], []>} : vector<8x128xf32>, vector<128x128xf32>, vector<8x128xf32> -> vector<8x128xf32>
    %4 = vector.broadcast %2 : vector<1x128xf32> to vector<8x128xf32>
    %5 = arith.addf %3, %4 : vector<8x128xf32>
    %cst_5 = arith.constant 0.000000e+00 : f32
    %6 = vector.broadcast %cst_5 : f32 to vector<8x128xf32>
    %7 = arith.maximumf %5, %6 : vector<8x128xf32>
    %c0_6 = arith.constant 0 : index
    %c0_7 = arith.constant 0 : index
    %8 = vector.load %arg4[%c0_6, %c0_7] : memref<128x128xf32, #tpu.memory_space<vmem>>, vector<128x128xf32>
    %c0_8 = arith.constant 0 : index
    %c0_9 = arith.constant 0 : index
    %9 = vector.load %arg5[%c0_8, %c0_9] : memref<1x128xf32, #tpu.memory_space<vmem>>, vector<1x128xf32>
    %cst_10 = arith.constant dense<0.000000e+00> : vector<8x128xf32>
    %10 = tpu.matmul %7, %8, %cst_10 {dimension_numbers = #tpu.dot_dimension_numbers<[1], [0], [0], [1], [0, 0, 1, 1], [], []>} : vector<8x128xf32>, vector<128x128xf32>, vector<8x128xf32> -> vector<8x128xf32>
    %11 = vector.broadcast %9 : vector<1x128xf32> to vector<8x128xf32>
    %12 = arith.addf %10, %11 : vector<8x128xf32>
    %cst_11 = arith.constant 0.000000e+00 : f32
    %13 = vector.broadcast %cst_11 : f32 to vector<8x128xf32>
    %14 = arith.maximumf %12, %13 : vector<8x128xf32>
    %c0_12 = arith.constant 0 : index
    %c0_13 = arith.constant 0 : index
    %15 = vector.load %arg6[%c0_12, %c0_13] : memref<128x128xf32, #tpu.memory_space<vmem>>, vector<128x128xf32>
    %c0_14 = arith.constant 0 : index
    %c0_15 = arith.constant 0 : index
    %16 = vector.load %arg7[%c0_14, %c0_15] : memref<1x128xf32, #tpu.memory_space<vmem>>, vector<1x128xf32>
    %cst_16 = arith.constant dense<0.000000e+00> : vector<8x128xf32>
    %17 = tpu.matmul %14, %15, %cst_16 {dimension_numbers = #tpu.dot_dimension_numbers<[1], [0], [0], [1], [0, 0, 1, 1], [], []>} : vector<8x128xf32>, vector<128x128xf32>, vector<8x128xf32> -> vector<8x128xf32>
    %18 = vector.broadcast %16 : vector<1x128xf32> to vector<8x128xf32>
    %19 = arith.addf %17, %18 : vector<8x128xf32>
    %cst_17 = arith.constant 0.000000e+00 : f32
    %20 = vector.broadcast %cst_17 : f32 to vector<8x128xf32>
    %21 = arith.maximumf %19, %20 : vector<8x128xf32>
    %c0_18 = arith.constant 0 : index
    %c0_19 = arith.constant 0 : index
    %22 = vector.load %arg8[%c0_18, %c0_19] : memref<8x128xf32, #tpu.memory_space<vmem>>, vector<8x128xf32>
    tpu.vector_store %arg8[%c0_18, %c0_19], %21 {strides = array<i32>} : memref<8x128xf32, #tpu.memory_space<vmem>>, vector<8x128xf32>,
    return
  }
  func.func @transform_0(%arg0: i32) -> (i32, i32) {
    %c0_i32 = arith.constant 0 : i32
    %c0_i32_0 = arith.constant 0 : i32
    return %arg0, %c0_i32 : i32, i32
  }
  func.func @transform_1(%arg0: i32) -> (i32, i32) {
    %c0_i32 = arith.constant 0 : i32
    %c0_i32_0 = arith.constant 0 : i32
    %c0_i32_1 = arith.constant 0 : i32
    return %c0_i32, %c0_i32_0 : i32, i32
  }
  func.func @transform_2(%arg0: i32) -> (i32, i32) {
    %c0_i32 = arith.constant 0 : i32
    %c0_i32_0 = arith.constant 0 : i32
    %c0_i32_1 = arith.constant 0 : i32
    return %c0_i32, %c0_i32_0 : i32, i32
  }
  func.func @transform_3(%arg0: i32) -> (i32, i32) {
    %c0_i32 = arith.constant 0 : i32
    %c0_i32_0 = arith.constant 0 : i32
    %c0_i32_1 = arith.constant 0 : i32
    return %c0_i32, %c0_i32_0 : i32, i32
  }
  func.func @transform_4(%arg0: i32) -> (i32, i32) {
    %c0_i32 = arith.constant 0 : i32
    %c0_i32_0 = arith.constant 0 : i32
    %c0_i32_1 = arith.constant 0 : i32
    return %c0_i32, %c0_i32_0 : i32, i32
  }
  func.func @transform_5(%arg0: i32) -> (i32, i32) {
    %c0_i32 = arith.constant 0 : i32
    %c0_i32_0 = arith.constant 0 : i32
    %c0_i32_1 = arith.constant 0 : i32
    return %c0_i32, %c0_i32_0 : i32, i32
  }
  func.func @transform_6(%arg0: i32) -> (i32, i32) {
    %c0_i32 = arith.constant 0 : i32
    %c0_i32_0 = arith.constant 0 : i32
    %c0_i32_1 = arith.constant 0 : i32
    return %c0_i32, %c0_i32_0 : i32, i32
  }
  func.func @transform_7(%arg0: i32) -> (i32, i32) {
    %c0_i32 = arith.constant 0 : i32
    %c0_i32_0 = arith.constant 0 : i32
    return %arg0, %c0_i32 : i32, i32
  }
}

</mosaic_0001>

<bundles_post_ra>
// kernel: tpu_custom_call.1
= control target key start
LH: loop header
LB: loop body
LE: loop exit
PB: predicated region body
PF: predicated region fallthrough
CT: control target
= control target key end

     0   :  { %12 = vsyncpa [#allocation3], 0  ;;  %s441_s0 = inlined_call_operand.hbm [shape: f32[8,128], index: 0, kind: input, shape index: {}]   ;;  %s442_s1 = inlined_call_operand.hbm [shape: f32[128,128], index: 1, kind: input, shape index: {}]   ;;  %s443_s2 = inlined_call_operand.vmem [shape: f32[1,128], index: 2, kind: input, shape index: {}]   ;;  %s444_s3 = inlined_call_operand.hbm [shape: f32[128,128], index: 3, kind: input, shape index: {}]   ;;  %s445_s4 = inlined_call_operand.vmem [shape: f32[1,128], index: 4, kind: input, shape index: {}]   ;;  %s446_s5 = inlined_call_operand.hbm [shape: f32[128,128], index: 5, kind: input, shape index: {}]   ;;  %s447_s6 = inlined_call_operand.vmem [shape: f32[1,128], index: 6, kind: input, shape index: {}]   ;;  %s448_s7 = inlined_call_operand.hbm [shape: f32[8,128], index: 7, kind: output, shape index: {}]  }
   0x1   :  { %13 = vsyncpa [#allocation6], 0 }
   0x2   :  { %14 = vsyncpa [#allocation9], 0  ;;  %s31_s26 = sshll.u32 %s442_s1, 4  ;;  %s32_s26 = int_to_ptr.hbm [resolvable:$true] %s31_s26 }
   0x3   :  { %15 = vsyncpa [#allocation4], 0  ;;  %s370_s27 = smov [#allocation5]   ;;  %s21_s8 = sshll.u32 %s441_s0, 4  ;;  %s22_s8 = int_to_ptr.hbm [resolvable:$true] %s21_s8 }
   0x4   :  { %s33_s28 = sshll.u32 %s370_s27, 4  ;;  %s371_s9 = smov 128   ;;  %s34_s28 = int_to_ptr.vmem [resolvable:$true] %s33_s28 }
   0x5   :  { %s372_s10 = smov 8   ;;  %s373_s11 = smov [#allocation2]  }
   0x6   :  { %39 = dma.hbm_to_vmem [thread:$0]  %s32_s26, 2048, %s34_s28, [#allocation6], %s371_s9, %s371_s9, %s372_s10  }
   0x7   :  { %s23_s12 = sshll.u32 %s373_s11, 4  ;;  %s46_s15 = sshll.u32 %s444_s3, 4  ;;  %s24_s12 = int_to_ptr.vmem [resolvable:$true] %s23_s12  ;;  %s47_s15 = int_to_ptr.hbm [resolvable:$true] %s46_s15 }
   0x8   :  { %26 = dma.hbm_to_vmem [thread:$0]  %s22_s8, 128, %s24_s12, [#allocation3]  }
   0x9   :  { %s61_s17 = sshll.u32 %s446_s5, 4  ;;  %s374_s18 = smov [#allocation7]   ;;  %s62_s17 = int_to_ptr.hbm [resolvable:$true] %s61_s17 }
   0xa   :  { %s48_s19 = sshll.u32 %s374_s18, 4  ;;  %s375_s0 = smov [#allocation8]   ;;  %s49_s19 = int_to_ptr.vmem [resolvable:$true] %s48_s19 }
   0xb   :  { %54 = dma.hbm_to_vmem [thread:$0]  %s47_s15, 2048, %s49_s19, [#allocation6], %s371_s9, %s371_s9, %s372_s10  }
   0xc   :  { %s63_s20 = sshll.u32 %s375_s0, 4  ;;  %s64_s20 = int_to_ptr.vmem [resolvable:$true] %s63_s20 }
   0xd   :  { %69 = dma.hbm_to_vmem [thread:$0]  %s62_s17, 2048, %s64_s20, [#allocation9], %s371_s9, %s371_s9, %s372_s10  }
   0xe   :  { %362 = dma.done.wait [#allocation3], 128  }
   0xf   :  { %363 = vsyncadd [#allocation3], 4294967168 }
  0x10   :  { %364 = dma.done.wait [#allocation6], 4096  }
  0x11   :  { %365 = vsyncadd [#allocation6], 4294963200 }
  0x12   :  { %366 = dma.done.wait [#allocation9], 2048  }
  0x13   :  { %367 = vsyncadd [#allocation9], 4294965248  ;;  %v104_v0 = vld [vmem:[#allocation5 + $0x78] sm:$0xff]  ;;  %v103_v1 = vld [vmem:[#allocation5 + $0x70] sm:$0xff]  ;;  %s376_s24 = smov [#allocation10]   ;;  %s220_s28 = sshll.u32 %s448_s7, 4  ;;  %s221_s28 = int_to_ptr.hbm [resolvable:$true] %s220_s28 }
  0x14   :  { %109 = vmatpush.msra.mxu0 %v104_v0  ;;  %v102_v2 = vld [vmem:[#allocation5 + $0x68] sm:$0xff]  ;;  %v101_v3 = vld [vmem:[#allocation5 + $0x60] sm:$0xff]  ;;  %v145_v4 = vld [vmem:[#allocation7 + $0x78] sm:$0xff]  ;;  %s218_s25 = sshll.u32 %s376_s24, 4  ;;  %s219_s25 = int_to_ptr.vmem [resolvable:$true] %s218_s25 }
  0x15   :  { %v100_v5 = vld [vmem:[#allocation5 + $0x58] sm:$0xff]  ;;  %150 = vmatpush.msra.mxu1 %v145_v4  ;;  %v144_v6 = vld [vmem:[#allocation7 + $0x70] sm:$0xff]  ;;  %v143_v7 = vld [vmem:[#allocation7 + $0x68] sm:$0xff] }
  0x16   :  { %110 = vmatpush.msra.mxu0 %v103_v1  ;;  %v99_v8 = vld [vmem:[#allocation5 + $0x50] sm:$0xff]  ;;  %v142_v9 = vld [vmem:[#allocation7 + $0x60] sm:$0xff]  ;;  %v98_v10 = vld [vmem:[#allocation5 + $0x48] sm:$0xff] }
  0x17   :  { %151 = vmatpush.msra.mxu1 %v144_v6  ;;  %v141_v11 = vld [vmem:[#allocation7 + $0x58] sm:$0xff]  ;;  %v97_v12 = vld [vmem:[#allocation5 + $0x40] sm:$0xff]  ;;  %v140_v13 = vld [vmem:[#allocation7 + $0x50] sm:$0xff] }
  0x18   :  { %111 = vmatpush.msra.mxu0 %v102_v2  ;;  %v96_v14 = vld [vmem:[#allocation5 + $0x38] sm:$0xff]  ;;  %v139_v15 = vld [vmem:[#allocation7 + $0x48] sm:$0xff]  ;;  %v95_v16 = vld [vmem:[#allocation5 + $0x30] sm:$0xff] }
  0x19   :  { %152 = vmatpush.msra.mxu1 %v143_v7  ;;  %v138_v17 = vld [vmem:[#allocation7 + $0x40] sm:$0xff]  ;;  %v94_v18 = vld [vmem:[#allocation5 + $0x28] sm:$0xff]  ;;  %v137_v19 = vld [vmem:[#allocation7 + $0x38] sm:$0xff] }
  0x1a   :  { %112 = vmatpush.msra.mxu0 %v101_v3  ;;  %v93_v20 = vld [vmem:[#allocation5 + $0x20] sm:$0xff]  ;;  %v136_v21 = vld [vmem:[#allocation7 + $0x30] sm:$0xff]  ;;  %v92_v22 = vld [vmem:[#allocation5 + $0x18] sm:$0xff] }
  0x1b   :  { %153 = vmatpush.msra.mxu1 %v142_v9  ;;  %v135_v23 = vld [vmem:[#allocation7 + $0x28] sm:$0xff]  ;;  %v91_v24 = vld [vmem:[#allocation5 + $0x10] sm:$0xff]  ;;  %v134_v25 = vld [vmem:[#allocation7 + $0x20] sm:$0xff] }
  0x1c   :  { %113 = vmatpush.msra.mxu0 %v100_v5  ;;  %v90_v26 = vld [vmem:[#allocation5 + $0x8] sm:$0xff]  ;;  %v133_v27 = vld [vmem:[#allocation7 + $0x18] sm:$0xff]  ;;  %v89_v28 = vld [vmem:[#allocation5] sm:$0xff] }
  0x1d   :  { %154 = vmatpush.msra.mxu1 %v141_v11  ;;  %v88_v29 = vld [vmem:[#allocation2] sm:$0xff]  ;;  %v132_v30 = vld [vmem:[#allocation7 + $0x10] sm:$0xff]  ;;  %v131_v31 = vld [vmem:[#allocation7 + $0x8] sm:$0xff] }
  0x1e   :  { %114 = vmatpush.msra.mxu0 %v99_v8  ;;  %v130_v32 = vld [vmem:[#allocation7] sm:$0xff]  ;;  %v186_v33 = vld [vmem:[#allocation8 + $0x78] sm:$0xff]  ;;  %v185_v34 = vld [vmem:[#allocation8 + $0x70] sm:$0xff] }
  0x1f   :  { %155 = vmatpush.msra.mxu1 %v140_v13  ;;  %191 = vmatpush.msra.mxu2 %v186_v33  ;;  %v184_v35 = vld [vmem:[#allocation8 + $0x68] sm:$0xff]  ;;  %v183_v36 = vld [vmem:[#allocation8 + $0x60] sm:$0xff]  ;;  %v182_v37 = vld [vmem:[#allocation8 + $0x58] sm:$0xff] }
  0x20   :  { %115 = vmatpush.msra.mxu0 %v98_v10  ;;  %v181_v38 = vld [vmem:[#allocation8 + $0x50] sm:$0xff]  ;;  %v180_v39 = vld [vmem:[#allocation8 + $0x48] sm:$0xff]  ;;  %v179_v40 = vld [vmem:[#allocation8 + $0x40] sm:$0xff] }
  0x21   :  { %156 = vmatpush.msra.mxu1 %v139_v15  ;;  %192 = vmatpush.msra.mxu2 %v185_v34  ;;  %v178_v41 = vld [vmem:[#allocation8 + $0x38] sm:$0xff]  ;;  %v177_v42 = vld [vmem:[#allocation8 + $0x30] sm:$0xff]  ;;  %v176_v43 = vld [vmem:[#allocation8 + $0x28] sm:$0xff] }
  0x22   :  { %116 = vmatpush.msra.mxu0 %v97_v12  ;;  %v175_v44 = vld [vmem:[#allocation8 + $0x20] sm:$0xff]  ;;  %v174_v45 = vld [vmem:[#allocation8 + $0x18] sm:$0xff]  ;;  %v173_v50 = vld [vmem:[#allocation8 + $0x10] sm:$0xff] }
  0x23   :  { %157 = vmatpush.msra.mxu1 %v138_v17  ;;  %193 = vmatpush.msra.mxu2 %v184_v35  ;;  %v239_v46 = vld [vmem:[%s443_s2] ss:$0 sm:$0xff]  ;;  %v172_v51 = vld [vmem:[#allocation8 + $0x8] sm:$0xff]  ;;  %v171_v52 = vld [vmem:[#allocation8] sm:$0xff] }
  0x24   :  { %117 = vmatpush.msra.mxu0 %v96_v14  ;;  %v240_v53 = vld [vmem:[%s445_s4] ss:$0 sm:$0xff] }
  0x25   :  { %158 = vmatpush.msra.mxu1 %v137_v19  ;;  %194 = vmatpush.msra.mxu2 %v183_v36  ;;  %v241_v57 = vld [vmem:[%s447_s6] ss:$0 sm:$0xff] }
  0x26   :  { %118 = vmatpush.msra.mxu0 %v95_v16 }
  0x27   :  { %159 = vmatpush.msra.mxu1 %v136_v21  ;;  %195 = vmatpush.msra.mxu2 %v182_v37 }
  0x28   :  { %119 = vmatpush.msra.mxu0 %v94_v18 }
  0x29   :  { %160 = vmatpush.msra.mxu1 %v135_v23  ;;  %196 = vmatpush.msra.mxu2 %v181_v38 }
  0x2a   :  { %120 = vmatpush.msra.mxu0 %v93_v20 }
  0x2b   :  { %161 = vmatpush.msra.mxu1 %v134_v25  ;;  %197 = vmatpush.msra.mxu2 %v180_v39 }
  0x2c   :  { %121 = vmatpush.msra.mxu0 %v92_v22 }
  0x2d   :  { %162 = vmatpush.msra.mxu1 %v133_v27  ;;  %198 = vmatpush.msra.mxu2 %v179_v40 }
  0x2e   :  { %122 = vmatpush.msra.mxu0 %v91_v24 }
  0x2f   :  { %163 = vmatpush.msra.mxu1 %v132_v30  ;;  %199 = vmatpush.msra.mxu2 %v178_v41 }
  0x30   :  { %123 = vmatpush.msra.mxu0 %v90_v26 }
  0x31   :  { %164 = vmatpush.msra.mxu1 %v131_v31  ;;  %200 = vmatpush.msra.mxu2 %v177_v42 }
  0x32   :  { %124 = vmatpush.msra.mxu0 %v89_v28 }
  0x33   :  { %125 = vmatmul.f32.vlgmr.msra.gmra.mxu0 %v88_v29  ;;  %165 = vmatpush.msra.mxu1 %v130_v32 }
  0x34   :  { %201 = vmatpush.msra.mxu2 %v176_v43 }
  0x36   :  { %202 = vmatpush.msra.mxu2 %v175_v44 }
  0x38   :  { %203 = vmatpush.msra.mxu2 %v174_v45 }
  0x3a   :  { %204 = vmatpush.msra.mxu2 %v173_v50 }
  0x3c   :  { %205 = vmatpush.msra.mxu2 %v172_v51 }
  0x3e   :  { %206 = vmatpush.msra.mxu2 %v171_v52 }
  0xb0   :  { %v126_v47 = vpop.f32.mrf.mxu0 }
  0xb1   :  { %v127_v48 = vadd.f32 %v239_v46, %v126_v47 }
  0xb3   :  { %v129_v49 = vmax.f32 %v127_v48, 0.0 }
  0xb5   :  { %166 = vmatmul.f32.vlgmr.msra.gmra.mxu1 %v129_v49 }
 0x132   :  { %v167_v54 = vpop.f32.mrf.mxu1 }
 0x133   :  { %v168_v55 = vadd.f32 %v240_v53, %v167_v54 }
 0x135   :  { %v170_v56 = vmax.f32 %v168_v55, 0.0 }
 0x137   :  { %207 = vmatmul.f32.vlgmr.msra.gmra.mxu2 %v170_v56 }
 0x1ba   :  { %v208_v58 = vpop.f32.mrf.mxu2 }
 0x1bb   :  { %v209_v59 = vadd.f32 %v241_v57, %v208_v58 }
 0x1bd   :  { %v211_v60 = vmax.f32 %v209_v59, 0.0 }
 0x1bf   :  { %212 = vst [vmem:[#allocation10] sm:$0xff] %v211_v60 }
 0x1c0   :  { %223 = dma.vmem_to_hbm [thread:$0]  %s219_s25, 128, %s221_s28, [#allocation4]  }
 0x1c1   :  { %368 = dma.done.wait [#allocation4], 128  }
 0x1c2   :  { %369 = vsyncadd [#allocation4], 4294967168 }
 0x1c3   :  { %228 = vsyncpa [#allocation3], 1 }
 0x1c4   :  { %229 = vsyncpa [#allocation6], 1 }
 0x1c5   :  { %230 = vsyncpa [#allocation9], 1 }
 0x1c6   :  { %231 = vsyncpa [#allocation4], 1 }

// kernel: tpu_custom_call.1
= control target key start
LH: loop header
LB: loop body
LE: loop exit
PB: predicated region body
PF: predicated region fallthrough
CT: control target
= control target key end

     0   :  { %12 = vsyncpa [#allocation3], 0  ;;  %s441_s0 = inlined_call_operand.hbm [shape: f32[8,128], index: 0, kind: input, shape index: {}]   ;;  %s442_s1 = inlined_call_operand.hbm [shape: f32[128,128], index: 1, kind: input, shape index: {}]   ;;  %s443_s2 = inlined_call_operand.vmem [shape: f32[1,128], index: 2, kind: input, shape index: {}]   ;;  %s444_s3 = inlined_call_operand.hbm [shape: f32[128,128], index: 3, kind: input, shape index: {}]   ;;  %s445_s4 = inlined_call_operand.vmem [shape: f32[1,128], index: 4, kind: input, shape index: {}]   ;;  %s446_s5 = inlined_call_operand.hbm [shape: f32[128,128], index: 5, kind: input, shape index: {}]   ;;  %s447_s6 = inlined_call_operand.vmem [shape: f32[1,128], index: 6, kind: input, shape index: {}]   ;;  %s448_s7 = inlined_call_operand.hbm [shape: f32[8,128], index: 7, kind: output, shape index: {}]  }
   0x1   :  { %13 = vsyncpa [#allocation6], 0 }
   0x2   :  { %14 = vsyncpa [#allocation9], 0  ;;  %s31_s26 = sshll.u32 %s442_s1, 4  ;;  %s32_s26 = int_to_ptr.hbm [resolvable:$true] %s31_s26 }
   0x3   :  { %15 = vsyncpa [#allocation4], 0  ;;  %s370_s27 = smov [#allocation5]   ;;  %s21_s8 = sshll.u32 %s441_s0, 4  ;;  %s22_s8 = int_to_ptr.hbm [resolvable:$true] %s21_s8 }
   0x4   :  { %s33_s28 = sshll.u32 %s370_s27, 4  ;;  %s371_s9 = smov 128   ;;  %s34_s28 = int_to_ptr.vmem [resolvable:$true] %s33_s28 }
   0x5   :  { %s372_s10 = smov 8   ;;  %s373_s11 = smov [#allocation2]  }
   0x6   :  { %39 = dma.hbm_to_vmem [thread:$0]  %s32_s26, 2048, %s34_s28, [#allocation6], %s371_s9, %s371_s9, %s372_s10  }
   0x7   :  { %s23_s12 = sshll.u32 %s373_s11, 4  ;;  %s46_s15 = sshll.u32 %s444_s3, 4  ;;  %s24_s12 = int_to_ptr.vmem [resolvable:$true] %s23_s12  ;;  %s47_s15 = int_to_ptr.hbm [resolvable:$true] %s46_s15 }
   0x8   :  { %26 = dma.hbm_to_vmem [thread:$0]  %s22_s8, 128, %s24_s12, [#allocation3]  }
   0x9   :  { %s61_s17 = sshll.u32 %s446_s5, 4  ;;  %s374_s18 = smov [#allocation7]   ;;  %s62_s17 = int_to_ptr.hbm [resolvable:$true] %s61_s17 }
   0xa   :  { %s48_s19 = sshll.u32 %s374_s18, 4  ;;  %s375_s0 = smov [#allocation8]   ;;  %s49_s19 = int_to_ptr.vmem [resolvable:$true] %s48_s19 }
   0xb   :  { %54 = dma.hbm_to_vmem [thread:$0]  %s47_s15, 2048, %s49_s19, [#allocation6], %s371_s9, %s371_s9, %s372_s10  }
   0xc   :  { %s63_s20 = sshll.u32 %s375_s0, 4  ;;  %s64_s20 = int_to_ptr.vmem [resolvable:$true] %s63_s20 }
   0xd   :  { %69 = dma.hbm_to_vmem [thread:$0]  %s62_s17, 2048, %s64_s20, [#allocation9], %s371_s9, %s371_s9, %s372_s10  }
   0xe   :  { %362 = dma.done.wait [#allocation3], 128  }
   0xf   :  { %363 = vsyncadd [#allocation3], 4294967168 }
  0x10   :  { %364 = dma.done.wait [#allocation6], 4096  }
  0x11   :  { %365 = vsyncadd [#allocation6], 4294963200 }
  0x12   :  { %366 = dma.done.wait [#allocation9], 2048  }
  0x13   :  { %367 = vsyncadd [#allocation9], 4294965248  ;;  %v104_v0 = vld [vmem:[#allocation5 + $0x78] sm:$0xff]  ;;  %v103_v1 = vld [vmem:[#allocation5 + $0x70] sm:$0xff]  ;;  %s376_s24 = smov [#allocation10]   ;;  %s220_s28 = sshll.u32 %s448_s7, 4  ;;  %s221_s28 = int_to_ptr.hbm [resolvable:$true] %s220_s28 }
  0x14   :  { %109 = vmatpush.msra.mxu0 %v104_v0  ;;  %v102_v2 = vld [vmem:[#allocation5 + $0x68] sm:$0xff]  ;;  %v101_v3 = vld [vmem:[#allocation5 + $0x60] sm:$0xff]  ;;  %v145_v4 = vld [vmem:[#allocation7 + $0x78] sm:$0xff]  ;;  %s218_s25 = sshll.u32 %s376_s24, 4  ;;  %s219_s25 = int_to_ptr.vmem [resolvable:$true] %s218_s25 }
  0x15   :  { %v100_v5 = vld [vmem:[#allocation5 + $0x58] sm:$0xff]  ;;  %150 = vmatpush.msra.mxu1 %v145_v4  ;;  %v144_v6 = vld [vmem:[#allocation7 + $0x70] sm:$0xff]  ;;  %v143_v7 = vld [vmem:[#allocation7 + $0x68] sm:$0xff] }
  0x16   :  { %110 = vmatpush.msra.mxu0 %v103_v1  ;;  %v99_v8 = vld [vmem:[#allocation5 + $0x50] sm:$0xff]  ;;  %v142_v9 = vld [vmem:[#allocation7 + $0x60] sm:$0xff]  ;;  %v98_v10 = vld [vmem:[#allocation5 + $0x48] sm:$0xff] }
  0x17   :  { %151 = vmatpush.msra.mxu1 %v144_v6  ;;  %v141_v11 = vld [vmem:[#allocation7 + $0x58] sm:$0xff]  ;;  %v97_v12 = vld [vmem:[#allocation5 + $0x40] sm:$0xff]  ;;  %v140_v13 = vld [vmem:[#allocation7 + $0x50] sm:$0xff] }
  0x18   :  { %111 = vmatpush.msra.mxu0 %v102_v2  ;;  %v96_v14 = vld [vmem:[#allocation5 + $0x38] sm:$0xff]  ;;  %v139_v15 = vld [vmem:[#allocation7 + $0x48] sm:$0xff]  ;;  %v95_v16 = vld [vmem:[#allocation5 + $0x30] sm:$0xff] }
  0x19   :  { %152 = vmatpush.msra.mxu1 %v143_v7  ;;  %v138_v17 = vld [vmem:[#allocation7 + $0x40] sm:$0xff]  ;;  %v94_v18 = vld [vmem:[#allocation5 + $0x28] sm:$0xff]  ;;  %v137_v19 = vld [vmem:[#allocation7 + $0x38] sm:$0xff] }
  0x1a   :  { %112 = vmatpush.msra.mxu0 %v101_v3  ;;  %v93_v20 = vld [vmem:[#allocation5 + $0x20] sm:$0xff]  ;;  %v136_v21 = vld [vmem:[#allocation7 + $0x30] sm:$0xff]  ;;  %v92_v22 = vld [vmem:[#allocation5 + $0x18] sm:$0xff] }
  0x1b   :  { %153 = vmatpush.msra.mxu1 %v142_v9  ;;  %v135_v23 = vld [vmem:[#allocation7 + $0x28] sm:$0xff]  ;;  %v91_v24 = vld [vmem:[#allocation5 + $0x10] sm:$0xff]  ;;  %v134_v25 = vld [vmem:[#allocation7 + $0x20] sm:$0xff] }
  0x1c   :  { %113 = vmatpush.msra.mxu0 %v100_v5  ;;  %v90_v26 = vld [vmem:[#allocation5 + $0x8] sm:$0xff]  ;;  %v133_v27 = vld [vmem:[#allocation7 + $0x18] sm:$0xff]  ;;  %v89_v28 = vld [vmem:[#allocation5] sm:$0xff] }
  0x1d   :  { %154 = vmatpush.msra.mxu1 %v141_v11  ;;  %v88_v29 = vld [vmem:[#allocation2] sm:$0xff]  ;;  %v132_v30 = vld [vmem:[#allocation7 + $0x10] sm:$0xff]  ;;  %v131_v31 = vld [vmem:[#allocation7 + $0x8] sm:$0xff] }
  0x1e   :  { %114 = vmatpush.msra.mxu0 %v99_v8  ;;  %v130_v32 = vld [vmem:[#allocation7] sm:$0xff]  ;;  %v186_v33 = vld [vmem:[#allocation8 + $0x78] sm:$0xff]  ;;  %v185_v34 = vld [vmem:[#allocation8 + $0x70] sm:$0xff] }
  0x1f   :  { %155 = vmatpush.msra.mxu1 %v140_v13  ;;  %191 = vmatpush.msra.mxu2 %v186_v33  ;;  %v184_v35 = vld [vmem:[#allocation8 + $0x68] sm:$0xff]  ;;  %v183_v36 = vld [vmem:[#allocation8 + $0x60] sm:$0xff]  ;;  %v182_v37 = vld [vmem:[#allocation8 + $0x58] sm:$0xff] }
  0x20   :  { %115 = vmatpush.msra.mxu0 %v98_v10  ;;  %v181_v38 = vld [vmem:[#allocation8 + $0x50] sm:$0xff]  ;;  %v180_v39 = vld [vmem:[#allocation8 + $0x48] sm:$0xff]  ;;  %v179_v40 = vld [vmem:[#allocation8 + $0x40] sm:$0xff] }
  0x21   :  { %156 = vmatpush.msra.mxu1 %v139_v15  ;;  %192 = vmatpush.msra.mxu2 %v185_v34  ;;  %v178_v41 = vld [vmem:[#allocation8 + $0x38] sm:$0xff]  ;;  %v177_v42 = vld [vmem:[#allocation8 + $0x30] sm:$0xff]  ;;  %v176_v43 = vld [vmem:[#allocation8 + $0x28] sm:$0xff] }
  0x22   :  { %116 = vmatpush.msra.mxu0 %v97_v12  ;;  %v175_v44 = vld [vmem:[#allocation8 + $0x20] sm:$0xff]  ;;  %v174_v45 = vld [vmem:[#allocation8 + $0x18] sm:$0xff]  ;;  %v173_v50 = vld [vmem:[#allocation8 + $0x10] sm:$0xff] }
  0x23   :  { %157 = vmatpush.msra.mxu1 %v138_v17  ;;  %193 = vmatpush.msra.mxu2 %v184_v35  ;;  %v239_v46 = vld [vmem:[%s443_s2] ss:$0 sm:$0xff]  ;;  %v172_v51 = vld [vmem:[#allocation8 + $0x8] sm:$0xff]  ;;  %v171_v52 = vld [vmem:[#allocation8] sm:$0xff] }
  0x24   :  { %117 = vmatpush.msra.mxu0 %v96_v14  ;;  %v240_v53 = vld [vmem:[%s445_s4] ss:$0 sm:$0xff] }
  0x25   :  { %158 = vmatpush.msra.mxu1 %v137_v19  ;;  %194 = vmatpush.msra.mxu2 %v183_v36  ;;  %v241_v57 = vld [vmem:[%s447_s6] ss:$0 sm:$0xff] }
  0x26   :  { %118 = vmatpush.msra.mxu0 %v95_v16 }
  0x27   :  { %159 = vmatpush.msra.mxu1 %v136_v21  ;;  %195 = vmatpush.msra.mxu2 %v182_v37 }
  0x28   :  { %119 = vmatpush.msra.mxu0 %v94_v18 }
  0x29   :  { %160 = vmatpush.msra.mxu1 %v135_v23  ;;  %196 = vmatpush.msra.mxu2 %v181_v38 }
  0x2a   :  { %120 = vmatpush.msra.mxu0 %v93_v20 }
  0x2b   :  { %161 = vmatpush.msra.mxu1 %v134_v25  ;;  %197 = vmatpush.msra.mxu2 %v180_v39 }
  0x2c   :  { %121 = vmatpush.msra.mxu0 %v92_v22 }
  0x2d   :  { %162 = vmatpush.msra.mxu1 %v133_v27  ;;  %198 = vmatpush.msra.mxu2 %v179_v40 }
  0x2e   :  { %122 = vmatpush.msra.mxu0 %v91_v24 }
  0x2f   :  { %163 = vmatpush.msra.mxu1 %v132_v30  ;;  %199 = vmatpush.msra.mxu2 %v178_v41 }
  0x30   :  { %123 = vmatpush.msra.mxu0 %v90_v26 }
  0x31   :  { %164 = vmatpush.msra.mxu1 %v131_v31  ;;  %200 = vmatpush.msra.mxu2 %v177_v42 }
  0x32   :  { %124 = vmatpush.msra.mxu0 %v89_v28 }
  0x33   :  { %125 = vmatmul.f32.vlgmr.msra.gmra.mxu0 %v88_v29  ;;  %165 = vmatpush.msra.mxu1 %v130_v32 }
  0x34   :  { %201 = vmatpush.msra.mxu2 %v176_v43 }
  0x36   :  { %202 = vmatpush.msra.mxu2 %v175_v44 }
  0x38   :  { %203 = vmatpush.msra.mxu2 %v174_v45 }
  0x3a   :  { %204 = vmatpush.msra.mxu2 %v173_v50 }
  0x3c   :  { %205 = vmatpush.msra.mxu2 %v172_v51 }
  0x3e   :  { %206 = vmatpush.msra.mxu2 %v171_v52 }
  0xb0   :  { %v126_v47 = vpop.f32.mrf.mxu0 }
  0xb1   :  { %v127_v48 = vadd.f32 %v239_v46, %v126_v47 }
  0xb3   :  { %v129_v49 = vmax.f32 %v127_v48, 0.0 }
  0xb5   :  { %166 = vmatmul.f32.vlgmr.msra.gmra.mxu1 %v129_v49 }
 0x132   :  { %v167_v54 = vpop.f32.mrf.mxu1 }
 0x133   :  { %v168_v55 = vadd.f32 %v240_v53, %v167_v54 }
 0x135   :  { %v170_v56 = vmax.f32 %v168_v55, 0.0 }
 0x137   :  { %207 = vmatmul.f32.vlgmr.msra.gmra.mxu2 %v170_v56 }
 0x1ba   :  { %v208_v58 = vpop.f32.mrf.mxu2 }
 0x1bb   :  { %v209_v59 = vadd.f32 %v241_v57, %v208_v58 }
 0x1bd   :  { %v211_v60 = vmax.f32 %v209_v59, 0.0 }
 0x1bf   :  { %212 = vst [vmem:[#allocation10] sm:$0xff] %v211_v60 }
 0x1c0   :  { %223 = dma.vmem_to_hbm [thread:$0]  %s219_s25, 128, %s221_s28, [#allocation4]  }
 0x1c1   :  { %368 = dma.done.wait [#allocation4], 128  }
 0x1c2   :  { %369 = vsyncadd [#allocation4], 4294967168 }
 0x1c3   :  { %228 = vsyncpa [#allocation3], 1 }
 0x1c4   :  { %229 = vsyncpa [#allocation6], 1 }
 0x1c5   :  { %230 = vsyncpa [#allocation9], 1 }
 0x1c6   :  { %231 = vsyncpa [#allocation4], 1 }

</bundles_post_ra>
